<compile_context>
chip_gen: v7x
topology: tpu7x:2x2x1
jax: 0.10.0
libtpu: 0.0.40
codegen_flags: <defaults>
</compile_context>

<pallas_src>
import functools
import math

import jax
import jax.numpy as jnp
from jax.experimental import pallas as pl
from jax.experimental.pallas import tpu as pltpu


def _attention_kernel(hidden_ref, enc_ref, mask_ref,
                      wht_ref, wet_ref, b_ref, v_ref, out_ref,
                      *, tb, seq_len, compute_dtype):
    # Shapes for one batch tile (tb rows):
    #   hidden_ref: (tb, Ddec) bf16    enc_ref: (tb*S, Denc) bf16    mask_ref: (tb, S) f32
    #   wht_ref:    (Ddec, Ddec) bf16  [pre-transposed, used as h @ Wh^T]
    #   wet_ref:    (Denc, Ddec) bf16  [pre-transposed, used as enc @ We^T]
    #   b_ref, v_ref: (1, Ddec) f32    out_ref: (tb, S) f32
    ddec = wht_ref.shape[1]

    # hidden part + bias: independent of the sequence position -> computed once per tile.
    hid_bias = jnp.dot(hidden_ref[...], wht_ref[...],
                       preferred_element_type=jnp.float32) + b_ref[...]     # (tb, Ddec) f32

    # encoder part: one MXU matmul over all (batch, seq) rows of this tile.
    enc_part = jnp.dot(enc_ref[...], wet_ref[...],
                       preferred_element_type=jnp.float32)                  # (tb*S, Ddec) f32

    # Elementwise chain (add + tanh + *v) in `compute_dtype`:
    #   bf16 on v6e/v7x (bf16 VALU/EUP -> ~2x throughput), f32 on <=v5 chips.
    # The (tb*S, Ddec) -> (tb, S, Ddec) sublane split is relayout-free because S % 8 == 0 here.
    # TODO(synk): for general S (not a multiple of 8), broadcast hid_bias to (tb*S, Ddec)
    # and keep the add 2-D instead of reshaping enc_part to 3-D.
    e3 = enc_part.reshape(tb, seq_len, ddec).astype(compute_dtype)
    hb = hid_bias.astype(compute_dtype)[:, None, :]                         # (tb, 1, Ddec)
    vv = v_ref[...].astype(compute_dtype)                                   # (1, Ddec)
    energy = jnp.tanh(e3 + hb)                                              # (tb, S, Ddec)

    # v-projection: VPU multiply + lane reduce (f32 accumulation), no transpose / M=1 matmul.
    # TODO(synk): if production Ddec stays at 32, pack 4 (batch,seq) row groups per vreg
    # (segmented 128-lane reduce) to lift EUP/VALU lane occupancy ~4x.
    scores = jnp.sum((energy * vv).astype(jnp.float32), axis=-1)            # (tb, S) f32

    # masked_fill(mask == 0, -1e10) then numerically stable softmax over S (all f32).
    masked = jnp.where(mask_ref[...] == 0.0, -10000000000.0, scores)
    m = jnp.max(masked, axis=-1, keepdims=True)
    e = jnp.exp(masked - m)
    denom = jnp.sum(e, axis=-1, keepdims=True)
    # Exact reciprocal (one EUP op per row): rows sum to 1 tightly.
    out_ref[...] = e * pl.reciprocal(denom)


def _elementwise_dtype():
    """bf16 for the tanh/score chain on chips with packed-bf16 VALU/EUP (v6e/v7x)."""
    kind = jax.devices()[0].device_kind.lower()
    if any(tag in kind for tag in ("v2", "v3", "v4", "v5")):
        return jnp.float32   # no packed-bf16 vector units: bf16 would only add converts
    return jnp.bfloat16      # v6e / v7x


def _pick_batch_tile(batch, seq, denc, enc_itemsize, *,
                     target_rows=1024, min_steps=4,
                     enc_vmem_budget_bytes=12 * 1024 * 1024):
    """Pick a batch tile so the grid pipelines enc DMA against compute.

    Valid tiles are `batch` itself or any multiple of 8 dividing `batch` (keeps every
    block's second-to-last dim sublane aligned).  Prefers ~target_rows enc rows per step,
    >= min_steps grid steps, and a double-buffered enc block inside the VMEM budget
    (budget chosen so the kernel also fits v7x's smaller 64 MiB VMEM with headroom).
    """
    cands = [batch] + [t for t in range(8, batch, 8) if batch % t == 0]

    def fits(t):
        return 2 * t * seq * denc * enc_itemsize <= enc_vmem_budget_bytes

    for pred in (
        lambda t: fits(t) and t * seq <= target_rows and batch // t >= min_steps,
        lambda t: fits(t) and t * seq <= target_rows and batch // t >= 2,
        lambda t: fits(t),
    ):
        good = [t for t in cands if pred(t)]
        if good:
            return max(good)
    return min(cands)


def attention_forward(hidden, encoder_outputs, attn_mask, params, *, batch_tile=None):
    """hidden: (1, B, Ddec); encoder_outputs: (B, S, Denc); attn_mask: (B, S)."""
    Wh_T, We_T, b, v = params["Wh_T"], params["We_T"], params["b"], params["v"]
    B, S, Denc = encoder_outputs.shape
    Ddec = hidden.shape[2]

    # enc is the dominant HBM stream -> ship it (plus hidden/weights) as bf16; the dots
    # keep f32 accumulation so the MXU loses nothing.
    io_dtype = jnp.bfloat16
    compute_dtype = _elementwise_dtype()

    tb = (_pick_batch_tile(B, S, Denc, jnp.dtype(io_dtype).itemsize)
          if batch_tile is None else batch_tile)
    assert B % tb == 0, "batch_tile must divide B"

    hidden2 = hidden[0].astype(io_dtype)                           # (B, Ddec)
    enc2 = encoder_outputs.reshape(B * S, Denc).astype(io_dtype)   # (B*S, Denc)
    mask2 = attn_mask.astype(jnp.float32)                          # (B, S)
    wht = Wh_T.astype(io_dtype)                                    # (Ddec, Ddec)
    wet = We_T.astype(io_dtype)                                    # (Denc, Ddec)
    b32 = b.astype(jnp.float32)                                    # (1, Ddec)
    v32 = v.astype(jnp.float32)                                    # (1, Ddec)

    kernel = functools.partial(_attention_kernel, tb=tb, seq_len=S,
                               compute_dtype=compute_dtype)

    out = pl.pallas_call(
        kernel,
        out_shape=jax.ShapeDtypeStruct((B, S), jnp.float32),
        grid_spec=pltpu.PrefetchScalarGridSpec(
            num_scalar_prefetch=0,
            grid=(B // tb,),
            in_specs=[
                pl.BlockSpec((tb, Ddec), lambda i: (i, 0)),        # hidden (B, Ddec)
                pl.BlockSpec((tb * S, Denc), lambda i: (i, 0)),    # encoder_outputs (B*S, Denc)
                pl.BlockSpec((tb, S), lambda i: (i, 0)),           # attn_mask (B, S)
                pl.BlockSpec((Ddec, Ddec), lambda i: (0, 0)),      # Wh^T (resident)
                pl.BlockSpec((Denc, Ddec), lambda i: (0, 0)),      # We^T (resident)
                pl.BlockSpec((1, Ddec), lambda i: (0, 0)),         # bias
                pl.BlockSpec((1, Ddec), lambda i: (0, 0)),         # v
            ],
            out_specs=pl.BlockSpec((tb, S), lambda i: (i, 0)),
        ),
        compiler_params=pltpu.CompilerParams(
            # Batch tiles are independent -> shards across v7x's 2 TensorCores.
            dimension_semantics=("parallel",),
            # Uniform scoped-VMEM limit: covers the 12 MiB enc double-buffer + resident
            # weights with room to spare, and leaves headroom on v7x's 64 MiB VMEM.
            vmem_limit_bytes=32 * 1024 * 1024,
        ),
    )(hidden2, enc2, mask2, wht, wet, b32, v32)
    return out


def reference_forward(hidden, encoder_outputs, attn_mask, W_attn, b_attn, v_w):
    """Pure-JAX mirror of the PyTorch forward for correctness checking."""
    B, S, _ = encoder_outputs.shape
    hrep = jnp.transpose(jnp.tile(hidden, (S, 1, 1)), (1, 0, 2))    # (B, S, Ddec)
    cat = jnp.concatenate([hrep, encoder_outputs], axis=2)
    energy = jnp.tanh(cat @ W_attn.T + b_attn.reshape(-1))
    attention = (energy @ v_w.T)[..., 0]                            # (B, S)
    attention = jnp.where(attn_mask == 0, -10000000000.0, attention)
    return jax.nn.softmax(attention, axis=1)


if __name__ == "__main__":
    B, S, ENC_HID, DEC_HID = 2, 8, 32, 32

    key = jax.random.PRNGKey(0)
    k_h, k_e, k_m, k_w, k_b, k_v = jax.random.split(key, 6)

    hidden = jax.random.normal(k_h, (1, B, DEC_HID), jnp.float32)
    encoder_outputs = jax.random.normal(k_e, (B, S, ENC_HID), jnp.float32)
    attn_mask = (jax.random.uniform(k_m, (B, S)) > 0.3).astype(jnp.float32)
    attn_mask = attn_mask.at[:, 0].set(1.0)   # at least one unmasked position per row

    # Deterministic parameter init (PyTorch nn.Linear-style uniform bounds).
    in_feat = ENC_HID + DEC_HID
    ka = 1.0 / math.sqrt(in_feat)
    W_attn = jax.random.uniform(k_w, (DEC_HID, in_feat), jnp.float32, -ka, ka)
    b_attn = jax.random.uniform(k_b, (1, DEC_HID), jnp.float32, -ka, ka)
    kv = 1.0 / math.sqrt(DEC_HID)
    v_w = jax.random.uniform(k_v, (1, DEC_HID), jnp.float32, -kv, kv)

    params = {
        # cat puts hidden first: W_attn = [Wh | We]; pre-transpose on host so the
        # kernel does h @ Wh^T and enc @ We^T without any in-kernel transpose.
        "Wh_T": jnp.transpose(W_attn[:, :DEC_HID]),   # (Ddec, Ddec)
        "We_T": jnp.transpose(W_attn[:, DEC_HID:]),   # (Denc, Ddec)
        "b": b_attn,                                  # (1, Ddec)
        "v": v_w,                                     # (1, Ddec)
    }

    out = attention_forward(hidden, encoder_outputs, attn_mask, params)
    jax.block_until_ready(out)

    ref = reference_forward(hidden, encoder_outputs, attn_mask, W_attn, b_attn, v_w)
    assert out.shape == (B, S)
    # Tolerance accounts for bf16 matmul inputs (and bf16 tanh chain on v6e/v7x);
    # the softmax max/exp/sum/reciprocal themselves are exact f32.
    assert jnp.allclose(out, ref, atol=1e-2, rtol=1e-2), "mismatch vs reference"
    assert jnp.allclose(jnp.sum(out, axis=1), 1.0, atol=1e-4), "rows must sum to 1"

    print("KERNEL_OK")
</pallas_src>

<mosaic_0001>
module attributes {stable_mosaic.version = 11 : i64} {
  func.func @_attention_kernel(%arg0: i32, %arg1: memref<2x32xbf16, #tpu.memory_space<vmem>>, %arg2: memref<16x32xbf16, #tpu.memory_space<vmem>>, %arg3: memref<2x8xf32, #tpu.memory_space<vmem>>, %arg4: memref<32x32xbf16, #tpu.memory_space<vmem>>, %arg5: memref<32x32xbf16, #tpu.memory_space<vmem>>, %arg6: memref<1x32xf32, #tpu.memory_space<vmem>>, %arg7: memref<1x32xf32, #tpu.memory_space<vmem>>, %arg8: memref<2x8xf32, #tpu.memory_space<vmem>>) attributes {dimension_semantics = [#tpu.dimension_semantics<parallel>], iteration_bounds = array<i64: 1>, scalar_prefetch = 0 : i64, scratch_operands = 0 : i64, tpu.core_type = #tpu.core_type<tc>, window_params = [{transform_indices = @transform_0, window_bounds = array<i64: 2, 32>}, {transform_indices = @transform_1, window_bounds = array<i64: 16, 32>}, {transform_indices = @transform_2, window_bounds = array<i64: 2, 8>}, {pipeline_mode = #tpu.pipeline_mode<synchronous>, transform_indices = @transform_3, window_bounds = array<i64: 32, 32>}, {pipeline_mode = #tpu.pipeline_mode<synchronous>, transform_indices = @transform_4, window_bounds = array<i64: 32, 32>}, {pipeline_mode = #tpu.pipeline_mode<synchronous>, transform_indices = @transform_5, window_bounds = array<i64: 1, 32>}, {pipeline_mode = #tpu.pipeline_mode<synchronous>, transform_indices = @transform_6, window_bounds = array<i64: 1, 32>}, {transform_indices = @transform_7, window_bounds = array<i64: 2, 8>}]} {
    %c0 = arith.constant 0 : index
    %c0_0 = arith.constant 0 : index
    %0 = vector.load %arg1[%c0, %c0_0] : memref<2x32xbf16, #tpu.memory_space<vmem>>, vector<2x32xbf16>
    %c0_1 = arith.constant 0 : index
    %c0_2 = arith.constant 0 : index
    %1 = vector.load %arg4[%c0_1, %c0_2] : memref<32x32xbf16, #tpu.memory_space<vmem>>, vector<32x32xbf16>
    %cst = arith.constant dense<0.000000e+00> : vector<2x32xf32>
    %2 = tpu.matmul %0, %1, %cst {dimension_numbers = #tpu.dot_dimension_numbers<[1], [0], [0], [1], [0, 0, 1, 1], [], []>} : vector<2x32xbf16>, vector<32x32xbf16>, vector<2x32xf32> -> vector<2x32xf32>
    %c0_3 = arith.constant 0 : index
    %c0_4 = arith.constant 0 : index
    %3 = vector.load %arg6[%c0_3, %c0_4] : memref<1x32xf32, #tpu.memory_space<vmem>>, vector<1x32xf32>
    %4 = vector.broadcast %3 : vector<1x32xf32> to vector<2x32xf32>
    %5 = arith.addf %2, %4 : vector<2x32xf32>
    %c0_5 = arith.constant 0 : index
    %c0_6 = arith.constant 0 : index
    %6 = vector.load %arg2[%c0_5, %c0_6] : memref<16x32xbf16, #tpu.memory_space<vmem>>, vector<16x32xbf16>
    %c0_7 = arith.constant 0 : index
    %c0_8 = arith.constant 0 : index
    %7 = vector.load %arg5[%c0_7, %c0_8] : memref<32x32xbf16, #tpu.memory_space<vmem>>, vector<32x32xbf16>
    %cst_9 = arith.constant dense<0.000000e+00> : vector<16x32xf32>
    %8 = tpu.matmul %6, %7, %cst_9 {dimension_numbers = #tpu.dot_dimension_numbers<[1], [0], [0], [1], [0, 0, 1, 1], [], []>} : vector<16x32xbf16>, vector<32x32xbf16>, vector<16x32xf32> -> vector<16x32xf32>
    %9 = vector.shape_cast %8 : vector<16x32xf32> to vector<2x8x32xf32>
    %10 = arith.truncf %9 : vector<2x8x32xf32> to vector<2x8x32xbf16>
    %11 = arith.truncf %5 : vector<2x32xf32> to vector<2x32xbf16>
    %12 = vector.shape_cast %11 : vector<2x32xbf16> to vector<2x1x32xbf16>
    %c0_10 = arith.constant 0 : index
    %c0_11 = arith.constant 0 : index
    %13 = vector.load %arg7[%c0_10, %c0_11] : memref<1x32xf32, #tpu.memory_space<vmem>>, vector<1x32xf32>
    %14 = arith.truncf %13 : vector<1x32xf32> to vector<1x32xbf16>
    %15 = vector.broadcast %12 : vector<2x1x32xbf16> to vector<2x8x32xbf16>
    %16 = arith.addf %10, %15 : vector<2x8x32xbf16>
    %17 = math.tanh %16 : vector<2x8x32xbf16>
    %18 = vector.shape_cast %14 : vector<1x32xbf16> to vector<1x1x32xbf16>
    %19 = vector.broadcast %18 : vector<1x1x32xbf16> to vector<2x8x32xbf16>
    %20 = arith.mulf %17, %19 : vector<2x8x32xbf16>
    %21 = arith.extf %20 : vector<2x8x32xbf16> to vector<2x8x32xf32>
    %cst_12 = arith.constant dense<0.000000e+00> : vector<2x8xf32>
    %22 = vector.multi_reduction <add>, %21, %cst_12 [2] : vector<2x8x32xf32> to vector<2x8xf32>
    %c0_13 = arith.constant 0 : index
    %c0_14 = arith.constant 0 : index
    %23 = vector.load %arg3[%c0_13, %c0_14] : memref<2x8xf32, #tpu.memory_space<vmem>>, vector<2x8xf32>
    %cst_15 = arith.constant 0.000000e+00 : f32
    %24 = vector.broadcast %cst_15 : f32 to vector<2x8xf32>
    %25 = arith.cmpf oeq, %23, %24 : vector<2x8xf32>
    %cst_16 = arith.constant -1.000000e+10 : f32
    %26 = vector.broadcast %cst_16 : f32 to vector<2x8xf32>
    %27 = arith.select %25, %26, %22 : vector<2x8xi1>, vector<2x8xf32>
    %cst_17 = arith.constant dense<0xFF800000> : vector<2xf32>
    %28 = vector.multi_reduction <maximumf>, %27, %cst_17 [1] : vector<2x8xf32> to vector<2xf32>
    %29 = vector.shape_cast %28 : vector<2xf32> to vector<2x1xf32>
    %30 = vector.broadcast %29 : vector<2x1xf32> to vector<2x8xf32>
    %31 = arith.subf %27, %30 : vector<2x8xf32>
    %32 = math.exp %31 : vector<2x8xf32>
    %cst_18 = arith.constant dense<0.000000e+00> : vector<2xf32>
    %33 = vector.multi_reduction <add>, %32, %cst_18 [1] : vector<2x8xf32> to vector<2xf32>
    %34 = vector.shape_cast %33 : vector<2xf32> to vector<2x1xf32>
    %35 = tpu.reciprocal %34 : vector<2x1xf32> -> vector<2x1xf32>
    %36 = vector.broadcast %35 : vector<2x1xf32> to vector<2x8xf32>
    %37 = arith.mulf %32, %36 : vector<2x8xf32>
    %c0_19 = arith.constant 0 : index
    %c0_20 = arith.constant 0 : index
    %38 = vector.load %arg8[%c0_19, %c0_20] : memref<2x8xf32, #tpu.memory_space<vmem>>, vector<2x8xf32>
    tpu.vector_store %arg8[%c0_19, %c0_20], %37 {strides = array<i32>} : memref<2x8xf32, #tpu.memory_space<vmem>>, vector<2x8xf32>,
    return
  }
  func.func @transform_0(%arg0: i32) -> (i32, i32) {
    %c0_i32 = arith.constant 0 : i32
    %c0_i32_0 = arith.constant 0 : i32
    return %arg0, %c0_i32 : i32, i32
  }
  func.func @transform_1(%arg0: i32) -> (i32, i32) {
    %c0_i32 = arith.constant 0 : i32
    %c0_i32_0 = arith.constant 0 : i32
    return %arg0, %c0_i32 : i32, i32
  }
  func.func @transform_2(%arg0: i32) -> (i32, i32) {
    %c0_i32 = arith.constant 0 : i32
    %c0_i32_0 = arith.constant 0 : i32
    return %arg0, %c0_i32 : i32, i32
  }
  func.func @transform_3(%arg0: i32) -> (i32, i32) {
    %c0_i32 = arith.constant 0 : i32
    %c0_i32_0 = arith.constant 0 : i32
    %c0_i32_1 = arith.constant 0 : i32
    return %c0_i32, %c0_i32_0 : i32, i32
  }
  func.func @transform_4(%arg0: i32) -> (i32, i32) {
    %c0_i32 = arith.constant 0 : i32
    %c0_i32_0 = arith.constant 0 : i32
    %c0_i32_1 = arith.constant 0 : i32
    return %c0_i32, %c0_i32_0 : i32, i32
  }
  func.func @transform_5(%arg0: i32) -> (i32, i32) {
    %c0_i32 = arith.constant 0 : i32
    %c0_i32_0 = arith.constant 0 : i32
    %c0_i32_1 = arith.constant 0 : i32
    return %c0_i32, %c0_i32_0 : i32, i32
  }
  func.func @transform_6(%arg0: i32) -> (i32, i32) {
    %c0_i32 = arith.constant 0 : i32
    %c0_i32_0 = arith.constant 0 : i32
    %c0_i32_1 = arith.constant 0 : i32
    return %c0_i32, %c0_i32_0 : i32, i32
  }
  func.func @transform_7(%arg0: i32) -> (i32, i32) {
    %c0_i32 = arith.constant 0 : i32
    %c0_i32_0 = arith.constant 0 : i32
    return %arg0, %c0_i32 : i32, i32
  }
}

</mosaic_0001>

<bundles_post_ra>
// kernel: tpu_custom_call.1
= control target key start
LH: loop header
LB: loop body
LE: loop exit
PB: predicated region body
PF: predicated region fallthrough
CT: control target
= control target key end

     0   :  { %12 = vsyncpa [#allocation3], 0  ;;  %s638_s0 = inlined_call_operand.hbm [shape: bf16[2,32], index: 0, kind: input, shape index: {}]   ;;  %s639_s1 = inlined_call_operand.hbm [shape: bf16[16,32], index: 1, kind: input, shape index: {}]   ;;  %s640_s2 = inlined_call_operand.vmem [shape: f32[2,8], index: 2, kind: input, shape index: {}]   ;;  %s641_s3 = inlined_call_operand.hbm [shape: bf16[32,32], index: 3, kind: input, shape index: {}]   ;;  %s642_s4 = inlined_call_operand.hbm [shape: bf16[32,32], index: 4, kind: input, shape index: {}]   ;;  %s643_s5 = inlined_call_operand.vmem [shape: f32[1,32], index: 5, kind: input, shape index: {}]   ;;  %s644_s6 = inlined_call_operand.vmem [shape: f32[1,32], index: 6, kind: input, shape index: {}]   ;;  %s645_s7 = inlined_call_operand.hbm [shape: f32[2,8], index: 7, kind: output, shape index: {}]  }
   0x1   :  { %13 = vsyncpa [#allocation6], 0 }
   0x2   :  { %14 = vsyncpa [#allocation9], 0 }
   0x3   :  { %15 = vsyncpa [#allocation4], 0  ;;  %s503_s24 = smov [#allocation5]   ;;  %s385_s28 = scalar_lea.hbm %s639_s1, 128 }
   0x4   :  { %s31_s25 = sshll.u32 %s503_s24, 4  ;;  %p386_p0 = scmp.ne.s32.totalorder %s639_s1, %s385_s28  ;;  %s32_s25 = int_to_ptr.vmem [resolvable:$true] %s31_s25 }
   0x5   :  { %p389_p1 = scmp.lt.u32.totalorder %s385_s28, %s639_s1 }
   0x7   :  { %p391_p2 = pnand %p389_p1, %p386_p0 }
   0x9   :  { %394 = shalt.err (!%p391_p2)
}
   0xa   :  { %s395_s10 = scalar_lea.vmem %s32_s25, 128  ;;  %p400_p4 = scmp.lt.s32.totalorder %s32_s25, %s32_s25 }
   0xb   :  { %p396_p3 = scmp.ne.s32.totalorder %s32_s25, %s395_s10  ;;  %p401_p5 = scmp.lt.s32.totalorder %s395_s10, %s395_s10 }
   0xd   :  { %p402_p6 = por %p401_p5, %p400_p4 }
   0xf   :  { %p403_p7 = pnand %p402_p6, %p396_p3 }
  0x11   :  { %406 = shalt.err (!%p403_p7)
}
  0x12   :  { %s504_s11 = smov 64   ;;  %s505_s12 = smov 4  }
  0x13   :  { %37 = dma.hbm_to_vmem [thread:$0]  %s639_s1, 128, %s32_s25, [#allocation6], %s504_s11, %s504_s11, %s505_s12  }
  0x14   :  { %s506_s15 = smov [#allocation2]   ;;  %s507_s17 = smov [#allocation7]  }
  0x15   :  { %s22_s16 = sshll.u32 %s506_s15, 4  ;;  %s45_s18 = sshll.u32 %s507_s17, 4  ;;  %s23_s16 = int_to_ptr.vmem [resolvable:$true] %s22_s16  ;;  %s46_s18 = int_to_ptr.vmem [resolvable:$true] %s45_s18 }
  0x16   :  { %s407_s21 = scalar_lea.hbm %s638_s0, 16 }
  0x17   :  { %p408_p8 = scmp.ne.s32.totalorder %s638_s0, %s407_s21  ;;  %p411_p9 = scmp.lt.u32.totalorder %s407_s21, %s638_s0 }
  0x19   :  { %p413_p10 = pnand %p411_p9, %p408_p8 }
  0x1b   :  { %416 = shalt.err (!%p413_p10)
}
  0x1c   :  { %s417_s1 = scalar_lea.vmem %s23_s16, 16  ;;  %s421_s25 = scalar_lea.vmem %s23_s16, 32 }
  0x1d   :  { %p418_p11 = scmp.ne.s32.totalorder %s23_s16, %s417_s1  ;;  %p422_p12 = scmp.lt.s32.totalorder %s23_s16, %s23_s16 }
  0x1e   :  { %p423_p13 = scmp.lt.s32.totalorder %s421_s25, %s417_s1 }
  0x20   :  { %p424_p0 = por %p423_p13, %p422_p12 }
  0x22   :  { %p425_p1 = pnand %p424_p0, %p418_p11 }
  0x24   :  { %428 = shalt.err (!%p425_p1)
}
  0x25   :  { %25 = dma.hbm_to_vmem [thread:$0]  %s638_s0, 16, %s23_s16, [#allocation3]  }
  0x26   :  { %s429_s8 = scalar_lea.hbm %s641_s3, 256 }
  0x27   :  { %p430_p2 = scmp.ne.s32.totalorder %s641_s3, %s429_s8  ;;  %p433_p3 = scmp.lt.u32.totalorder %s429_s8, %s641_s3 }
  0x29   :  { %p435_p4 = pnand %p433_p3, %p430_p2 }
  0x2b   :  { %438 = shalt.err (!%p435_p4)
}
  0x2c   :  { %s439_s15 = scalar_lea.vmem %s46_s18, 256  ;;  %p444_p6 = scmp.lt.s32.totalorder %s46_s18, %s46_s18 }
  0x2d   :  { %p440_p5 = scmp.ne.s32.totalorder %s46_s18, %s439_s15  ;;  %p445_p7 = scmp.lt.s32.totalorder %s439_s15, %s439_s15 }
  0x2f   :  { %p446_p8 = por %p445_p7, %p444_p6 }
  0x31   :  { %p447_p9 = pnand %p446_p8, %p440_p5 }
  0x33   :  { %450 = shalt.err (!%p447_p9)
}
  0x34   :  { %51 = dma.hbm_to_vmem [thread:$0]  %s641_s3, 256, %s46_s18, [#allocation6], %s504_s11, %s504_s11, %s505_s12  }
  0x35   :  { %s508_s17 = smov [#allocation8]   ;;  %s451_s22 = scalar_lea.hbm %s642_s4, 256 }
  0x36   :  { %s57_s19 = sshll.u32 %s508_s17, 4  ;;  %p452_p10 = scmp.ne.s32.totalorder %s642_s4, %s451_s22  ;;  %s58_s19 = int_to_ptr.vmem [resolvable:$true] %s57_s19 }
  0x37   :  { %p455_p11 = scmp.lt.u32.totalorder %s451_s22, %s642_s4 }
  0x39   :  { %p457_p12 = pnand %p455_p11, %p452_p10 }
  0x3b   :  { %460 = shalt.err (!%p457_p12)
}
  0x3c   :  { %s461_s25 = scalar_lea.vmem %s58_s19, 256  ;;  %p466_p0 = scmp.lt.s32.totalorder %s58_s19, %s58_s19 }
  0x3d   :  { %p462_p13 = scmp.ne.s32.totalorder %s58_s19, %s461_s25  ;;  %p467_p1 = scmp.lt.s32.totalorder %s461_s25, %s461_s25 }
  0x3f   :  { %p468_p2 = por %p467_p1, %p466_p0 }
  0x41   :  { %p469_p3 = pnand %p468_p2, %p462_p13 }
  0x43   :  { %472 = shalt.err (!%p469_p3)
}
  0x44   :  { %63 = dma.hbm_to_vmem [thread:$0]  %s642_s4, 256, %s58_s19, [#allocation9], %s504_s11, %s504_s11, %s505_s12  }
  0x45   :  { %495 = dma.done.wait [#allocation3], 16  }
  0x46   :  { %496 = vsyncadd [#allocation3], 4294967280 }
  0x47   :  { %497 = dma.done.wait [#allocation6], 384  }
  0x48   :  { %498 = vsyncadd [#allocation6], 4294966912 }
  0x49   :  { %499 = dma.done.wait [#allocation9], 256  }
  0x4a   :  { %500 = vsyncadd [#allocation9], 4294967040  ;;  %v509_v0 = vmov 0.0   ;;  %vm510_vm0 = vmmov 0   ;;  %v372_v1 = vld [vmem:[#allocation7] sm:$0xff]   ;;  %v373_v2 = vld [vmem:[#allocation7 + $0x8] sm:$0xff]   ;;  %v223_v7 = vlaneseq }
  0x4b   :  { %346 = vmatprep.subr.bf16.mxu0 %v509_v0  ;;  %350 = vmatprep.mubr.msk.bf16.mxu0 %vm510_vm0, %v509_v0  ;;  %v374_v3 = vld [vmem:[#allocation8] sm:$0xff]   ;;  %v375_v4 = vld [vmem:[#allocation8 + $0x8] sm:$0xff]   ;;  %vm105_vm1 = vcmask 261120   ;;  %v511_v11 = vmov 1966171168   ;;  %vm297_vm2 = vcmask 1041409  }
  0x4c   :  { %354 = vmatprep.subr.bf16.mxu1 %v509_v0  ;;  %358 = vmatprep.mubr.msk.bf16.mxu1 %vm510_vm0, %v509_v0  ;;  %v81_v5 = vld [vmem:[#allocation2] sm:$0x1]  ;;  %v376_v6 = vld [vmem:[#allocation5] sm:$0xff]   ;;  %v224_v8 = vshrl.u32 %v223_v7, 7  ;;  %v288_v9 = vand.u32 127, %v223_v7  ;;  %v221_v12 = vunpack.c.l.s4 %v511_v11  ;;  %vm301_vm4 = vcmask 58368  }
  0x4d   :  { %347 = vmatpush3.bf16.msra.mxu0 %v372_v1  ;;  %355 = vmatpush3.bf16.msra.mxu1 %v374_v3  ;;  %v331_v14 = vld [vmem:[%s643_s5] ss:$0 sm:$0xff] }
  0x4e   :  { %348 = vmatprep.subr.bf16.mxu0 %v509_v0  ;;  %356 = vmatprep.subr.bf16.mxu1 %v509_v0  ;;  %v291_v10 = vsub.s32 %v288_v9, %v224_v8  ;;  %v222_v13 = vunpack.c.0.s8 %v221_v12  ;;  %v242_v28 = vsub.s32 0, %v224_v8  ;;  %v236_v38 = vld [vmem:[%s644_s6] sm:$0x1] }
  0x4f   :  { %v237_v43 = vpack.c.bf16 %v236_v38, %v236_v38  ;;  %v283_v55 = vld [vmem:[%s640_s2] sm:$0x3]  ;;  %s512_s2 = smov [#allocation10]  }
  0x50   :  { %v225_v17 = vsub.s32 %v222_v13, %v224_v8  ;;  %vm284_vm3 = vcmp.eq.f32.partialorder %v283_v55, 0.0  ;;  %s320_s28 = sshll.u32 %s512_s2, 4  ;;  %s321_s28 = int_to_ptr.vmem [resolvable:$true] %s320_s28 }
  0x51   :  { %349 = vmatpush3.bf16.msra.mxu0 %v373_v2  ;;  %357 = vmatpush3.bf16.msra.mxu1 %v375_v4  ;;  %v267_v44 = vpack.i.b16 %v237_v43, %v237_v43  ;;  %s473_s29 = scalar_lea.vmem %s321_s28, 32  ;;  %p478_p5 = scmp.lt.s32.totalorder %s321_s28, %s321_s28 }
  0x52   :  { %p474_p4 = scmp.ne.s32.totalorder %s321_s28, %s473_s29  ;;  %p479_p6 = scmp.lt.s32.totalorder %s473_s29, %s473_s29 }
  0x53   :  { %v272_v45 = vrot.slane %v267_v44, %v242_v28 }
  0x54   :  { %351 = vmatmul.mubr.msk.bf16.vlgmr.msra.gmra.mrb[0].mxu0 %vm105_vm1, %v81_v5  ;;  %359 = vmatmul.mubr.msk.bf16.vlgmr.msra.gmra.mrb[0].mxu1 %vm105_vm1, %v376_v6  ;;  %p480_p7 = por %p479_p6, %p478_p5 }
  0x56   :  { %p481_p8 = pnand %p480_p7, %p474_p4 }
 0x127   :  { %v143_v15 = vpop.f32.mrb[0].mxu0  ;;  %v209_v22 = vpop.f32.mrb[0].mxu1 }
 0x128   :  { %v144_v16 = vadd.f32 %v331_v14, %v143_v15  ;;  %v352_v18 = vpop.f32.mrb[1].mxu0  ;;  %v360_v23 = vpop.f32.mrb[1].mxu1  ;;  %v216_v33 = vpack.c.bf16 %v209_v22, %v209_v22 }
 0x129   :  { %v146_v19 = vpop.f32.mrb[2].mxu0  ;;  %v212_v25 = vpop.f32.mrb[2].mxu1 }
 0x12a   :  { %v218_v20 = vpack.c.bf16 %v144_v16, %v144_v16  ;;  %v353_v21 = vpop.f32.mrb[3].mxu0  ;;  %v361_v26 = vpop.f32.mrb[3].mxu1  ;;  %v217_v40 = vpack.c.bf16 %v212_v25, %v212_v25 }
 0x12c   :  { %v226_v24 = vrot.slane %v218_v20, %v225_v17 }
 0x12e   :  { %v233_v27 = vrot.slane %v226_v24, %v225_v17 }
 0x130   :  { %v235_v29 = vunpack.i.h.s16 %v233_v27  ;;  %v339_v30 = vpack.i.b16 %v233_v27, %v233_v27 }
 0x132   :  { %v239_v31 = vpack.i.b16 %v235_v29, %v235_v29  ;;  %v243_v32 = vrot.slane %v339_v30, %v242_v28 }
 0x134   :  { %v249_v34 = vpack.i.b16 %v243_v32, %v243_v32  ;;  %v247_v35 = vrot.slane %v239_v31, %v242_v28 }
 0x136   :  { %v254_v36 = vrot.slane %v249_v34, %v242_v28  ;;  %v256_v37 = vpack.i.b16 %v247_v35, %v247_v35 }
 0x138   :  { %v262_v39 = vadd.bf16 %v254_v36, %v216_v33  ;;  %v261_v41 = vrot.slane %v256_v37, %v242_v28 }
 0x13a   :  { %377 = vtanh.bf16 %v262_v39  ;;  %v263_v42 = vadd.bf16 %v261_v41, %v217_v40 }
 0x13c   :  { %379 = vtanh.bf16 %v263_v42 }
 0x145   :  { %v378_v46 = vpop.eup %377 }
 0x146   :  { %v273_v47 = vmul.bf16 %v378_v46, %v272_v45 }
 0x147   :  { %v380_v48 = vpop.eup %379 }
 0x148   :  { %v275_v49 = vunpack.c.l.bf16 %v273_v47  ;;  %v274_v50 = vmul.bf16 %v380_v48, %v272_v45 }
 0x14a   :  { %v277_v51 = vsel %vm105_vm1, %v275_v49, 0.0  ;;  %v276_v52 = vunpack.c.l.bf16 %v274_v50 }
 0x14b   :  { %278 = vadd.xlane.f32.xlu0 %v277_v51 }
 0x14c   :  { %v280_v53 = vsel %vm105_vm1, %v276_v52, 0.0 }
 0x14f   :  { %281 = vadd.xlane.f32.xlu0 %v280_v53 }
 0x1d8   :  { %v279_v54 = vpop.xlane.xlu0 %278 }
 0x1d9   :  { %v292_v57 = vrot.slane %v279_v54, %v291_v10 }
 0x1dc   :  { %v282_v56 = vpop.xlane.xlu0 %281 }
 0x1dd   :  { %v296_v58 = vrot.slane %v282_v56, %v291_v10 }
 0x1df   :  { %v298_v59 = vsel %vm297_vm2, %v296_v58, %v292_v57 }
 0x1e0   :  { %v300_v60 = vsel %vm284_vm3, -1e+10, %v298_v59 }
 0x1e1   :  { %v302_v61 = vsel %vm301_vm4, %v300_v60, -inf }
 0x1e2   :  { %303 = vmax.xlane.f32.xlu1 %v302_v61 }
 0x26f   :  { %v304_v62 = vpop.xlane.xlu1 %303 }
 0x270   :  { %v305_v63 = vsub.f32 %v300_v60, %v304_v62 }
 0x272   :  { %v306_v0 = vmul.f32 1.442695, %v305_v63 }
 0x274   :  { %381 = vpow2.f32 %v306_v0 }
 0x27e   :  { %v382_v1 = vpop.eup %381 }
 0x27f   :  { %v308_v2 = vsel %vm301_vm4, %v382_v1, 0.0 }
 0x280   :  { %309 = vadd.xlane.f32.xlu1 %v308_v2 }
 0x30d   :  { %v310_v3 = vpop.xlane.xlu1 %309 }
 0x30e   :  { %383 = vrcp.f32 %v310_v3 }
 0x318   :  { %v384_v4 = vpop.eup %383 }
 0x319   :  { %v312_v5 = vmul.f32 %v384_v4, %v382_v1 }
 0x31b   :  { %313 = vst.msk [vmem:[#allocation10] sm:$0x3] %vm301_vm4, %v312_v5 }
 0x31c   :  { %484 = shalt.err (!%p481_p8)
}
 0x31d   :  { %s485_s9 = scalar_lea.hbm %s645_s7, 32 }
 0x31e   :  { %p486_p9 = scmp.ne.s32.totalorder %s645_s7, %s485_s9  ;;  %p489_p10 = scmp.lt.u32.totalorder %s485_s9, %s645_s7 }
 0x320   :  { %p491_p11 = pnand %p489_p10, %p486_p9 }
 0x322   :  { %494 = shalt.err (!%p491_p11)
}
 0x323   :  { %323 = dma.vmem_to_hbm [thread:$0]  %s321_s28, 32, %s645_s7, [#allocation4]  }
 0x324   :  { %501 = dma.done.wait [#allocation4], 32  }
 0x325   :  { %502 = vsyncadd [#allocation4], 4294967264 }
 0x326   :  { %327 = vsyncpa [#allocation3], 1 }
 0x327   :  { %328 = vsyncpa [#allocation6], 1 }
 0x328   :  { %329 = vsyncpa [#allocation9], 1 }
 0x329   :  { %330 = vsyncpa [#allocation4], 1 }

</bundles_post_ra>
